<compile_context>
chip_gen: v5e
topology: v5e:2x2
jax: 0.10.0
libtpu: 0.0.40
codegen_flags: <defaults>
</compile_context>

<pallas_src>
import jax
import jax.numpy as jnp
from jax import lax
from jax.experimental import pallas as pl
from jax.experimental.pallas import tpu as pltpu


# --------------------------------------------------------------------------
# Stage 1: fused QKV projection  (each x row projected exactly once)
# --------------------------------------------------------------------------
def _qkv_proj_kernel(x_ref, w_ref, b_ref, q_ref, k_ref, v_ref):
    """One (batch, seq-tile) grid step.

    x_ref : (1, TS, D)   compute_dtype
    w_ref : (D, 3D)      compute_dtype   [Wq^T | Wk^T | Wv^T]
    b_ref : (1, 3D)      f32             [bq | bk | bv]
    q/k/v_ref : (1, TS, D) compute_dtype
    """
    D = q_ref.shape[-1]
    # One wide MXU pass with f32 accumulation; bias added in f32.
    qkv = jnp.dot(x_ref[0], w_ref[...],
                  preferred_element_type=jnp.float32) + b_ref[...]
    q_ref[0] = qkv[:, :D].astype(q_ref.dtype)
    k_ref[0] = qkv[:, D:2 * D].astype(k_ref.dtype)
    v_ref[0] = qkv[:, 2 * D:].astype(v_ref.dtype)


# --------------------------------------------------------------------------
# Stage 2: flash attention on precomputed q/k/v (online softmax, no S^2 tile)
# --------------------------------------------------------------------------
def _flash_attn_kernel(q_ref, k_ref, v_ref, o_ref, m_sc, l_sc, acc_sc):
    """One (batch, q-tile, kv-tile) grid step.

    q_ref : (1, TQ, D)  compute_dtype
    k_ref : (1, TK, D)  compute_dtype
    v_ref : (1, TK, D)  compute_dtype
    o_ref : (1, TQ, D)  output dtype (f32)
    scratch: m_sc (TQ,1), l_sc (TQ,1), acc_sc (TQ,D)   (all f32)
    """
    ki = pl.program_id(2)

    # ---- init (once per (b, q-tile); KV axis is the innermost reduction) ----
    @pl.when(ki == 0)
    def _():
        m_sc[...] = jnp.full_like(m_sc, -jnp.inf)
        l_sc[...] = jnp.zeros_like(l_sc)
        acc_sc[...] = jnp.zeros_like(acc_sc)

    q = q_ref[0]           # (TQ, D)
    k = k_ref[0]           # (TK, D)
    v = v_ref[0]           # (TK, D)

    # scores = q @ k^T, contracting last dims directly (no transposed copy);
    # f32 accumulation regardless of the (possibly bf16) MXU input dtype.
    s = lax.dot_general(q, k,
                        dimension_numbers=(((1,), (1,)), ((), ())),
                        preferred_element_type=jnp.float32)       # (TQ, TK)

    # ---- online softmax in f32 (no 1/sqrt(D) scaling, matching PyTorch) ----
    m_prev = m_sc[...]
    m_new = jnp.maximum(m_prev, jnp.max(s, axis=-1, keepdims=True))
    alpha = jnp.exp(m_prev - m_new)
    p = jnp.exp(s - m_new)                                        # f32
    l_sc[...] = alpha * l_sc[...] + jnp.sum(p, axis=-1, keepdims=True)
    acc_sc[...] = alpha * acc_sc[...] + jnp.dot(
        p.astype(v.dtype), v, preferred_element_type=jnp.float32)
    m_sc[...] = m_new

    # ---- finalize: one reciprocal-multiply per output tile, off the KV loop ----
    @pl.when(ki == pl.num_programs(2) - 1)
    def _():
        inv_l = pl.reciprocal(l_sc[...], approx=False)
        o_ref[0] = (acc_sc[...] * inv_l).astype(o_ref.dtype)


def _pick_seq_tile(s):
    # Prefer 512 so matmul N-dims fill the 2x256 MXU on v6e/v7x (128-multiples
    # already suffice for v5e's 4x128 MXU).
    for t in (512, 256, 128):
        if s % t == 0:
            return t
    return s   # small sequences: one tile covering the full extent


def self_attention(x, wq, bq, wk, bk, wv, bv, *, tq=None, tk=None,
                   compute_dtype=jnp.bfloat16):
    """x: (B, S, D). wq/wk/wv: (D, D) PyTorch nn.Linear weights (out, in).
    bq/bk/bv: (D,). Returns (B, S, D) in x.dtype.

    compute_dtype: MXU operand dtype (bf16 default for v5e/v6e/v7x throughput;
    pass jnp.float32 for exact-parity with an f32 reference)."""
    B, S, D = x.shape
    out_dtype = x.dtype
    isz = jnp.dtype(compute_dtype).itemsize

    # Fuse the three Linear layers into one slab; pre-transpose so the kernel
    # computes x @ W^T directly.  Cast MXU operands in the wrapper (halves the
    # DMA bytes for x and the weight slab when compute_dtype=bf16).
    w_qkv = jnp.concatenate([wq.T, wk.T, wv.T], axis=1).astype(compute_dtype)
    b_qkv = jnp.concatenate([bq, bk, bv]).reshape(1, 3 * D).astype(jnp.float32)
    x_c = x.astype(compute_dtype)

    # ---------------- stage 1: QKV projection ----------------
    ts = _pick_seq_tile(S)
    ns = S // ts
    proj_cost = pl.CostEstimate(
        flops=2 * B * S * D * 3 * D,
        transcendentals=0,
        bytes_accessed=isz * (B * S * D + 3 * D * D + 3 * B * S * D) + 4 * 3 * D,
    )
    qkv_struct = jax.ShapeDtypeStruct((B, S, D), compute_dtype)
    q, k, v = pl.pallas_call(
        _qkv_proj_kernel,
        out_shape=(qkv_struct, qkv_struct, qkv_struct),
        grid_spec=pltpu.PrefetchScalarGridSpec(
            num_scalar_prefetch=0,
            grid=(B, ns),
            in_specs=[
                pl.BlockSpec((1, ts, D), lambda b, si: (b, si, 0)),   # x rows
                pl.BlockSpec((D, 3 * D), lambda b, si: (0, 0)),       # fused W
                pl.BlockSpec((1, 3 * D), lambda b, si: (0, 0)),       # fused b
            ],
            out_specs=(
                pl.BlockSpec((1, ts, D), lambda b, si: (b, si, 0)),
                pl.BlockSpec((1, ts, D), lambda b, si: (b, si, 0)),
                pl.BlockSpec((1, ts, D), lambda b, si: (b, si, 0)),
            ),
        ),
        compiler_params=pltpu.CompilerParams(
            dimension_semantics=("parallel", "parallel"),
            vmem_limit_bytes=32 * 1024 * 1024),
        cost_estimate=proj_cost,
    )(x_c, w_qkv, b_qkv)

    # ---------------- stage 2: flash attention ----------------
    tq = _pick_seq_tile(S) if tq is None else tq
    tk = _pick_seq_tile(S) if tk is None else tk
    assert S % tq == 0 and S % tk == 0, "sequence must tile evenly"
    nq, nk = S // tq, S // tk
    # Megacore note (v7x): B and qi are both 'parallel'; B*nq should be >= 2
    # (and ideally even) so both TensorCores get work.

    attn_cost = pl.CostEstimate(
        flops=4 * B * S * S * D,                       # q@k^T + p@v
        transcendentals=B * S * S,                     # exp
        # q read once per (b,qi); k/v re-read once per q-tile; f32 output.
        bytes_accessed=isz * (B * S * D + 2 * B * nq * S * D) + 4 * B * S * D,
    )

    return pl.pallas_call(
        _flash_attn_kernel,
        out_shape=jax.ShapeDtypeStruct((B, S, D), out_dtype),
        grid_spec=pltpu.PrefetchScalarGridSpec(
            num_scalar_prefetch=0,
            grid=(B, nq, nk),
            in_specs=[
                pl.BlockSpec((1, tq, D), lambda b, qi, ki: (b, qi, 0)),
                pl.BlockSpec((1, tk, D), lambda b, qi, ki: (b, ki, 0)),
                pl.BlockSpec((1, tk, D), lambda b, qi, ki: (b, ki, 0)),
            ],
            out_specs=pl.BlockSpec((1, tq, D), lambda b, qi, ki: (b, qi, 0)),
            scratch_shapes=[
                pltpu.VMEM((tq, 1), jnp.float32),   # running max m
                pltpu.VMEM((tq, 1), jnp.float32),   # running denom l
                pltpu.VMEM((tq, D), jnp.float32),   # running numerator acc
            ],
        ),
        compiler_params=pltpu.CompilerParams(
            dimension_semantics=("parallel", "parallel", "arbitrary"),
            vmem_limit_bytes=32 * 1024 * 1024),
        cost_estimate=attn_cost,
    )(q, k, v)


# --------------------------------------------------------------------------
# Pure-JAX reference mirroring the PyTorch forward (and the kernel's
# mixed-precision choices when compute_dtype != f32).
# --------------------------------------------------------------------------
def self_attention_ref(x, wq, bq, wk, bk, wv, bv, compute_dtype=jnp.float32):
    cd = compute_dtype
    xc = x.astype(cd)

    def proj(w, b):
        y = jnp.einsum("bsd,ed->bse", xc, w.astype(cd),
                       preferred_element_type=jnp.float32) + b
        return y.astype(cd)

    q, k, v = proj(wq, bq), proj(wk, bk), proj(wv, bv)
    scores = jnp.einsum("bqd,bkd->bqk", q, k,
                        preferred_element_type=jnp.float32)
    attn = jax.nn.softmax(scores, axis=-1)
    out = jnp.einsum("bqk,bkd->bqd", attn.astype(cd), v,
                     preferred_element_type=jnp.float32)
    return out.astype(x.dtype)


def _make_params(key, B, S, D):
    kx, kwq, kbq, kwk, kbk, kwv, kbv = jax.random.split(key, 7)
    bound = 1.0 / (D ** 0.5)
    x = jax.random.normal(kx, (B, S, D), dtype=jnp.float32)
    u = lambda k, shp: jax.random.uniform(k, shp, minval=-bound, maxval=bound,
                                          dtype=jnp.float32)
    return (x, u(kwq, (D, D)), u(kbq, (D,)), u(kwk, (D, D)), u(kbk, (D,)),
            u(kwv, (D, D)), u(kbv, (D,)))


if __name__ == "__main__":
    key = jax.random.PRNGKey(0)
    k1, k2, k3 = jax.random.split(key, 3)

    # Test 1: small shape matching the module's convention (B, S, D) = (2, 8, 32),
    # f32 MXU path for exact parity with the plain f32 reference.
    x, wq, bq, wk, bk, wv, bv = _make_params(k1, 2, 8, 32)
    out = jax.block_until_ready(
        self_attention(x, wq, bq, wk, bk, wv, bv, compute_dtype=jnp.float32))
    ref = self_attention_ref(x, wq, bq, wk, bk, wv, bv)
    assert out.shape == (2, 8, 32)
    assert jnp.allclose(out, ref, atol=1e-5, rtol=1e-5), "mismatch (single-tile f32)"

    # Test 2: exercise the multi-tile online-softmax path (grid (2, 4, 4)), f32.
    x, wq, bq, wk, bk, wv, bv = _make_params(k2, 2, 32, 32)
    out = jax.block_until_ready(
        self_attention(x, wq, bq, wk, bk, wv, bv, tq=8, tk=8,
                       compute_dtype=jnp.float32))
    ref = self_attention_ref(x, wq, bq, wk, bk, wv, bv)
    assert out.shape == (2, 32, 32)
    assert jnp.allclose(out, ref, atol=1e-4, rtol=1e-4), "mismatch (flash-tiled f32)"

    # Test 3: default bf16 MXU path on lane-dense shapes (D multiple of 128),
    # multi-tile, compared against the matching mixed-precision reference.
    x, wq, bq, wk, bk, wv, bv = _make_params(k3, 2, 256, 128)
    out = jax.block_until_ready(
        self_attention(x, wq, bq, wk, bk, wv, bv, tq=128, tk=128))
    ref = self_attention_ref(x, wq, bq, wk, bk, wv, bv,
                             compute_dtype=jnp.bfloat16)
    assert out.shape == (2, 256, 128)
    assert jnp.allclose(out, ref, atol=5e-2, rtol=5e-2), "mismatch (flash-tiled bf16)"

    print("KERNEL_OK")
</pallas_src>

<mosaic_0001>
module attributes {stable_mosaic.version = 11 : i64} {
  func.func @_qkv_proj_kernel(%arg0: i32, %arg1: i32, %arg2: memref<1x8x32xf32, #tpu.memory_space<vmem>>, %arg3: memref<32x96xf32, #tpu.memory_space<vmem>>, %arg4: memref<1x96xf32, #tpu.memory_space<vmem>>, %arg5: memref<1x8x32xf32, #tpu.memory_space<vmem>>, %arg6: memref<1x8x32xf32, #tpu.memory_space<vmem>>, %arg7: memref<1x8x32xf32, #tpu.memory_space<vmem>>) attributes {dimension_semantics = [#tpu.dimension_semantics<parallel>, #tpu.dimension_semantics<parallel>], iteration_bounds = array<i64: 2, 1>, scalar_prefetch = 0 : i64, scratch_operands = 0 : i64, tpu.core_type = #tpu.core_type<tc>, window_params = [{transform_indices = @transform_0, window_bounds = array<i64: 1, 8, 32>}, {pipeline_mode = #tpu.pipeline_mode<synchronous>, transform_indices = @transform_1, window_bounds = array<i64: 32, 96>}, {pipeline_mode = #tpu.pipeline_mode<synchronous>, transform_indices = @transform_2, window_bounds = array<i64: 1, 96>}, {transform_indices = @transform_3, window_bounds = array<i64: 1, 8, 32>}, {transform_indices = @transform_4, window_bounds = array<i64: 1, 8, 32>}, {transform_indices = @transform_5, window_bounds = array<i64: 1, 8, 32>}]} {
    %c0 = arith.constant 0 : index
    %c0_0 = arith.constant 0 : index
    %c0_1 = arith.constant 0 : index
    %0 = vector.load %arg2[%c0, %c0_0, %c0_1] : memref<1x8x32xf32, #tpu.memory_space<vmem>>, vector<1x8x32xf32>
    %1 = vector.shape_cast %0 : vector<1x8x32xf32> to vector<8x32xf32>
    %c0_2 = arith.constant 0 : index
    %c0_3 = arith.constant 0 : index
    %2 = vector.load %arg3[%c0_2, %c0_3] : memref<32x96xf32, #tpu.memory_space<vmem>>, vector<32x96xf32>
    %cst = arith.constant dense<0.000000e+00> : vector<8x96xf32>
    %3 = tpu.matmul %1, %2, %cst {dimension_numbers = #tpu.dot_dimension_numbers<[1], [0], [0], [1], [0, 0, 1, 1], [], []>} : vector<8x32xf32>, vector<32x96xf32>, vector<8x96xf32> -> vector<8x96xf32>
    %c0_4 = arith.constant 0 : index
    %c0_5 = arith.constant 0 : index
    %4 = vector.load %arg4[%c0_4, %c0_5] : memref<1x96xf32, #tpu.memory_space<vmem>>, vector<1x96xf32>
    %5 = vector.broadcast %4 : vector<1x96xf32> to vector<8x96xf32>
    %6 = arith.addf %3, %5 : vector<8x96xf32>
    %7 = vector.extract_strided_slice %6 {offsets = [0, 0], sizes = [8, 32], strides = [1, 1]} : vector<8x96xf32> to vector<8x32xf32>
    %c0_6 = arith.constant 0 : index
    %c0_7 = arith.constant 0 : index
    %c0_8 = arith.constant 0 : index
    %8 = vector.load %arg5[%c0_6, %c0_7, %c0_8] : memref<1x8x32xf32, #tpu.memory_space<vmem>>, vector<1x8x32xf32>
    %9 = vector.shape_cast %8 : vector<1x8x32xf32> to vector<8x32xf32>
    %10 = vector.shape_cast %7 : vector<8x32xf32> to vector<1x8x32xf32>
    tpu.vector_store %arg5[%c0_6, %c0_7, %c0_8], %10 {strides = array<i32>} : memref<1x8x32xf32, #tpu.memory_space<vmem>>, vector<1x8x32xf32>,
    %11 = vector.extract_strided_slice %6 {offsets = [0, 32], sizes = [8, 32], strides = [1, 1]} : vector<8x96xf32> to vector<8x32xf32>
    %c0_9 = arith.constant 0 : index
    %c0_10 = arith.constant 0 : index
    %c0_11 = arith.constant 0 : index
    %12 = vector.load %arg6[%c0_9, %c0_10, %c0_11] : memref<1x8x32xf32, #tpu.memory_space<vmem>>, vector<1x8x32xf32>
    %13 = vector.shape_cast %12 : vector<1x8x32xf32> to vector<8x32xf32>
    %14 = vector.shape_cast %11 : vector<8x32xf32> to vector<1x8x32xf32>
    tpu.vector_store %arg6[%c0_9, %c0_10, %c0_11], %14 {strides = array<i32>} : memref<1x8x32xf32, #tpu.memory_space<vmem>>, vector<1x8x32xf32>,
    %15 = vector.extract_strided_slice %6 {offsets = [0, 64], sizes = [8, 32], strides = [1, 1]} : vector<8x96xf32> to vector<8x32xf32>
    %c0_12 = arith.constant 0 : index
    %c0_13 = arith.constant 0 : index
    %c0_14 = arith.constant 0 : index
    %16 = vector.load %arg7[%c0_12, %c0_13, %c0_14] : memref<1x8x32xf32, #tpu.memory_space<vmem>>, vector<1x8x32xf32>
    %17 = vector.shape_cast %16 : vector<1x8x32xf32> to vector<8x32xf32>
    %18 = vector.shape_cast %15 : vector<8x32xf32> to vector<1x8x32xf32>
    tpu.vector_store %arg7[%c0_12, %c0_13, %c0_14], %18 {strides = array<i32>} : memref<1x8x32xf32, #tpu.memory_space<vmem>>, vector<1x8x32xf32>,
    return
  }
  func.func @transform_0(%arg0: i32, %arg1: i32) -> (i32, i32, i32) {
    %c0_i32 = arith.constant 0 : i32
    %c0_i32_0 = arith.constant 0 : i32
    return %arg0, %arg1, %c0_i32 : i32, i32, i32
  }
  func.func @transform_1(%arg0: i32, %arg1: i32) -> (i32, i32) {
    %c0_i32 = arith.constant 0 : i32
    %c0_i32_0 = arith.constant 0 : i32
    %c0_i32_1 = arith.constant 0 : i32
    return %c0_i32, %c0_i32_0 : i32, i32
  }
  func.func @transform_2(%arg0: i32, %arg1: i32) -> (i32, i32) {
    %c0_i32 = arith.constant 0 : i32
    %c0_i32_0 = arith.constant 0 : i32
    %c0_i32_1 = arith.constant 0 : i32
    return %c0_i32, %c0_i32_0 : i32, i32
  }
  func.func @transform_3(%arg0: i32, %arg1: i32) -> (i32, i32, i32) {
    %c0_i32 = arith.constant 0 : i32
    %c0_i32_0 = arith.constant 0 : i32
    return %arg0, %arg1, %c0_i32 : i32, i32, i32
  }
  func.func @transform_4(%arg0: i32, %arg1: i32) -> (i32, i32, i32) {
    %c0_i32 = arith.constant 0 : i32
    %c0_i32_0 = arith.constant 0 : i32
    return %arg0, %arg1, %c0_i32 : i32, i32, i32
  }
  func.func @transform_5(%arg0: i32, %arg1: i32) -> (i32, i32, i32) {
    %c0_i32 = arith.constant 0 : i32
    %c0_i32_0 = arith.constant 0 : i32
    return %arg0, %arg1, %c0_i32 : i32, i32, i32
  }
}

</mosaic_0001>

<bundles_post_ra>
// kernel: tpu_custom_call.1
= control target key start
LH: loop header
LB: loop body
LE: loop exit
PB: predicated region body
PF: predicated region fallthrough
CT: control target
= control target key end

     0   :  { %s1102_s0 = inlined_call_operand.hbm [shape: f32[2,8,32], index: 0, kind: input, shape index: {}]   ;;  %s1103_s1 = inlined_call_operand.hbm [shape: f32[32,96], index: 1, kind: input, shape index: {}]   ;;  %s1104_s2 = inlined_call_operand.vmem [shape: f32[1,96], index: 2, kind: input, shape index: {}]   ;;  %s1105_s3 = inlined_call_operand.hbm [shape: f32[2,8,32], index: 3, kind: output, shape index: {0}]   ;;  %s1106_s4 = inlined_call_operand.hbm [shape: f32[2,8,32], index: 4, kind: output, shape index: {1}]   ;;  %s1107_s5 = inlined_call_operand.hbm [shape: f32[2,8,32], index: 5, kind: output, shape index: {2}]  }
   0x1   :  { %1109 = sst [smem:[#allocation15_spill]] %s1102_s0 }
   0x2   :  { %11 = vsyncpa [#allocation3], 0 }
   0x3   :  { %13 = vsyncpa [#allocation3 + $0x1], 0 }
   0x4   :  { %14 = vsyncpa [#allocation6], 0 }
   0x5   :  { %15 = vsyncpa [#allocation4], 0 }
   0x6   :  { %17 = vsyncpa [#allocation4 + $0x1], 0 }
   0x7   :  { %18 = vsyncpa [#allocation9], 0 }
   0x8   :  { %20 = vsyncpa [#allocation9 + $0x1], 0  ;;  %s906_s18 = smov 0   ;;  %s908_s19 = smov 0  }
   0x9   :  { %s910_s20 = smov 0   ;;  %s912_s21 = smov 0  }
   0xa   :  { %s914_s22 = smov 0   ;;  %s916_s23 = smov 0  }
   0xb LB: > { %s937_s24 = sadd.s32 4294967295, %s869_s23   ;;  %p555_p0 = scmp.ge.s32.totalorder %s869_s23, 1  ;;  %s869_s23 = sphi %s916_s23, %s26_s23   ;;  %s865_s22 = sphi %s914_s22, %s1121_s22   ;;  %s861_s21 = sphi %s912_s21, %s1120_s21   ;;  %s857_s20 = sphi %s910_s20, %s1119_s20   ;;  %s853_s19 = sphi %s908_s19, %s1118_s19   ;;  %s849_s18 = sphi %s906_s18, %s1117_s18  }
   0xc   : > { %p61_p1 = scmp.eq.s32.totalorder %s937_s24, 0  ;;  %p197_p2 = scmp.lt.s32.totalorder %s869_s23, 3 }
   0xd   : > { %s208_s27 = sshll.u32 %s1103_s1, 4  ;;  %s871_s29 = smov [#allocation5]   ;;  %s209_s27 = int_to_ptr.hbm [resolvable:$true] %s208_s27 }
   0xe   : > { %p945_p3 = pnand %p555_p0, %p197_p2  ;;  %s210_s30 = sshll.u32 %s871_s29, 4  ;;  %s211_s30 = int_to_ptr.vmem [resolvable:$true] %s210_s30 }
   0xf   : > { %p557_p6 = scmp.ge.s32.totalorder %s869_s23, 2  ;;  %s872_s6 = smov 128  }
  0x10   : > { %p587_p4 = pneg %p945_p3  ;;  %s873_s7 = smov 8  }
  0x11   : > { %s1108_s8 = sadd.s32 4294967294, %s869_s23   ;;  %s38_s9 = sadd.s32 1, %s865_s22 }
  0x12   : > { %p588_p5 = pnand %p587_p4, %p61_p1  ;;  %s47_s10 = sadd.s32 1, %s857_s20 }
  0x13   : > { %p40_p7 = scmp.ge.s32.totalorder %s38_s9, 2  ;;  %p54_p8 = scmp.ne.s32.totalorder %s857_s20, %s853_s19 }
  0x14   : > { %590 = dma.hbm_to_vmem [thread:$0]  (!%p588_p5), %s209_s27, 512, %s211_s30, [#allocation6], %s872_s6, %s872_s6, %s873_s7  }
  0x15   : > { %p55_p9 = scmp.eq.s32.totalorder %s869_s23, 0  ;;  %p60_p10 = scmp.ne.s32.totalorder %s853_s19, %s849_s18 }
  0x16   : > { %s1123_s9 = smov (%p40_p7, %s38_s9), 0  ;;  %p128_p13 = scmp.eq.s32.totalorder %s937_s24, 1 }
  0x17   : > { %p964_p11 = por %p55_p9, %p54_p8  ;;  %p970_p12 = por %p61_p1, %p60_p10 }
  0x18   : > { %s42_s13 = ssub.s32 %s865_s22, %s1123_s9  ;;  %p134_p2 = scmp.eq.s32.totalorder %s1108_s8, 1 }
  0x19   : > { %p45_p0 = scmp.eq.s32.totalorder %s42_s13, 0  ;;  %p979_p4 = por %p128_p13, %p54_p8 }
  0x1a   : > { %p606_p5 = scmp.lt.s32.totalorder %s869_s23, 2  ;;  %p987_p7 = por %p134_p2, %p60_p10 }
  0x1b   : > { %s985_s15 = scalar_select %p45_p0, %s857_s20, %s47_s10  }
  0x1c   : > { %s227_s17 = sand.u32 1, %s857_s20   ;;  %s559_s26 = sshll.u32 %s865_s22, 3 }
  0x1d   : > { %s558_s25 = sshll.u32 %s227_s17, 3  ;;  %s1115_s0 = sld [smem:[#allocation15_spill]] }
  0x1e   : > { %s231_s6 = scalar_lea.vmem [#allocation2], %s558_s25  ;;  %p592_p8 = pnand %p606_p5, %p964_p11 }
  0x1f   : > { %s240_s7 = sshll.u32 %s231_s6, 4  ;;  %s228_s10 = scalar_lea.sflag [#allocation3], %s227_s17  ;;  %s241_s7 = int_to_ptr.vmem [resolvable:$true] %s240_s7 }
  0x20   : > { %s1001_s8 = sand.u32 (!%p945_p3), 1, %s853_s19  }
  0x21   : > { %249 = sbr.rel (%p945_p3) target bundleno = 308 (0x134), region = 32  ;;  %s1004_s27 = sshll.u32 (!%p945_p3), %s1001_s8, 3 }
  0x22   : > { %s252_s25 = scalar_lea.sflag (!%p945_p3), [#allocation3], %s1001_s8 }
  0x23   : > { %s236_s30 = scalar_lea.hbm %s1115_s0, %s559_s26  ;;  %s255_s26 = scalar_lea.vmem (!%p945_p3), [#allocation2], %s1004_s27 }
  0x24   : > { %s238_s13 = sshll.u32 %s236_s30, 4  ;;  %s239_s13 = int_to_ptr.hbm [resolvable:$true] %s238_s13 }
  0x25   : > { %594 = dma.hbm_to_vmem [thread:$0]  (!%p592_p8), %s239_s13, 128, %s241_s7, %s228_s10  }
  0x26   : > { %832 = dma.done.wait (%p970_p12), %s252_s25, 128  }
  0x27   : > { %834 = vsyncadd (%p970_p12), %s252_s25, 4294967168 }
  0x28   : > { %836 = dma.done.wait (%p61_p1), [#allocation6], 512  }
  0x29   : > { %838 = vsyncadd (%p61_p1), [#allocation6], 4294966784  ;;  %v302_v0 = vld [vmem:[#allocation5 + $0x18] sm:$0xff]  ;;  %v301_v1 = vld [vmem:[#allocation5 + $0x10] sm:$0xff]  ;;  %vm307_vm0 = vcmask 261120   ;;  %s1018_s28 = sshll.u32 %s861_s21, 3 }
  0x2a   : > { %323 = vmatpush.msra.mxu0 %v302_v0  ;;  %v300_v2 = vld [vmem:[#allocation5 + $0x8] sm:$0xff]  ;;  %v299_v3 = vld [vmem:[#allocation5] sm:$0xff]  ;;  %v298_v4 = vld [vmem:[%s255_s26] sm:$0xff]  ;;  %s363_s30 = scalar_lea.hbm %s1105_s3, %s1018_s28  ;;  %s283_s6 = scalar_lea.vmem [#allocation7], %s1004_s27 }
  0x2b   : > { %v662_v5 = vld [vmem:[%s1104_s2] ss:$0 sm:$0xff]  ;;  %s365_s7 = sshll.u32 %s283_s6, 4  ;;  %s367_s13 = sshll.u32 %s363_s30, 4  ;;  %s366_s7 = int_to_ptr.vmem [resolvable:$true] %s365_s7  ;;  %s368_s13 = int_to_ptr.hbm [resolvable:$true] %s367_s13 }
  0x2c   : > { %324 = vmatpush.msra.mxu0 %v301_v1  ;;  %s874_s10 = smov 96   ;;  %s342_s21 = scalar_lea.sflag [#allocation4], %s1001_s8 }
  0x2d   : > { %s737_s25 = sshra.s32 %s368_s13, 4  ;;  %s743_s17 = scalar_lea.hbm %s1105_s3, 16  ;;  %s738_s25 = int_to_ptr.hbm [resolvable:$true] %s737_s25 }
  0x2e   : > { %325 = vmatpush.msra.mxu0 %v300_v2  ;;  %s739_s26 = scalar_lea.hbm %s738_s25, 8  ;;  %p744_p10 = scmp.lt.s32.totalorder %s738_s25, %s1105_s3 }
  0x2f   : > { %p740_p1 = scmp.ne.s32.totalorder %s738_s25, %s739_s26  ;;  %p745_p11 = scmp.lt.s32.totalorder %s743_s17, %s739_s26 }
  0x30   : > { %326 = vmatpush.msra.mxu0 %v299_v3 }
  0x31   : > { %566 = vmatmul.msk.f32.vlgmr.msra.gmra.mxu0 %vm307_vm0, %v298_v4  ;;  %p741_p3 = pnand %p740_p1, %p979_p4  ;;  %p746_p12 = por %p745_p11, %p744_p10 }
  0x33   : > { %p742_p9 = pneg %p741_p3 }
  0x35   : > { %p747_p13 = pnand %p746_p12, %p742_p9 }
  0xae   : > { %v328_v6 = vpop.f32.mrf.mxu0 }
  0xaf   : > { %v329_v7 = vadd.f32 %v662_v5, %v328_v6 }
  0xb1   : > { %333 = vrot.lane.b32.xlu0 %v329_v7, %s874_s10  ;;  %331 = vst.msk [vmem:[%s283_s6] sm:$0xff] %vm307_vm0, %v329_v7 }
  0xb2   : > { %750 = shalt.err (!%p747_p13)
}
  0xb3   : > { %581 = dma.vmem_to_hbm [thread:$0]  (%p979_p4), %s366_s7, 128, %s368_s13, %s342_s21  }
  0xb4   : > { %s875_s8 = smov 64   ;;  %s378_s11 = scalar_lea.hbm %s1106_s4, %s1018_s28 }
  0xb5   : > { %s346_s12 = sand.u32 1, %s937_s24   ;;  %s290_s25 = scalar_lea.vmem [#allocation8], %s1004_s27 }
  0xb6   : > { %s380_s26 = sshll.u32 %s290_s25, 4  ;;  %s382_s17 = sshll.u32 %s378_s11, 4  ;;  %s381_s26 = int_to_ptr.vmem [resolvable:$true] %s380_s26  ;;  %s383_s17 = int_to_ptr.hbm [resolvable:$true] %s382_s17 }
  0xb7   : > { %s393_s7 = scalar_lea.hbm %s1107_s5, %s1018_s28  ;;  %s1051_s13 = scalar_lea.sflag [#allocation9], %s346_s12 }
  0xb8   : > { %s765_s21 = sshra.s32 %s383_s17, 4  ;;  %s771_s10 = scalar_lea.hbm %s1106_s4, 16  ;;  %s766_s21 = int_to_ptr.hbm [resolvable:$true] %s765_s21 }
  0xb9   : > { %337 = vrot.lane.b32.xlu0 %v329_v7, %s875_s8  ;;  %s767_s8 = scalar_lea.hbm %s766_s21, 8  ;;  %p772_p8 = scmp.lt.s32.totalorder %s766_s21, %s1106_s4 }
  0xba   : > { %p768_p0 = scmp.ne.s32.totalorder %s766_s21, %s767_s8  ;;  %p773_p1 = scmp.lt.s32.totalorder %s771_s10, %s767_s8 }
  0xbc   : > { %p769_p2 = pnand %p768_p0, %p979_p4  ;;  %p774_p3 = por %p773_p1, %p772_p8 }
  0xbe   : > { %p770_p5 = pneg %p769_p2 }
  0xc0   : > { %p775_p9 = pnand %p774_p3, %p770_p5 }
 0x123   : > { %v334_v8 = vpop.permute.xlu0 %333 }
 0x124   : > { %336 = vst.msk [vmem:[%s290_s25] sm:$0xff] %vm307_vm0, %v334_v8 }
 0x125   : > { %778 = shalt.err (!%p775_p9)
}
 0x126   : > { %582 = dma.vmem_to_hbm [thread:$0]  (%p979_p4), %s381_s26, 128, %s383_s17, %s1051_s13  }
 0x127   : > { %s297_s28 = scalar_lea.vmem [#allocation10], %s1004_s27  ;;  %s397_s25 = sshll.u32 %s393_s7, 4  ;;  %s398_s25 = int_to_ptr.hbm [resolvable:$true] %s397_s25 }
 0x128   : > { %s395_s12 = sshll.u32 %s297_s28, 4  ;;  %s793_s0 = sshra.s32 %s398_s25, 4  ;;  %s396_s12 = int_to_ptr.vmem [resolvable:$true] %s395_s12  ;;  %s794_s0 = int_to_ptr.hbm [resolvable:$true] %s793_s0 }
 0x129   : > { %s795_s29 = scalar_lea.hbm %s794_s0, 8  ;;  %s799_s8 = scalar_lea.hbm %s1107_s5, 16 }
 0x12a   : > { %p796_p10 = scmp.ne.s32.totalorder %s794_s0, %s795_s29  ;;  %p800_p13 = scmp.lt.s32.totalorder %s794_s0, %s1107_s5 }
 0x12b   : > { %v338_v9 = vpop.permute.xlu0 %337  ;;  %p801_p0 = scmp.lt.s32.totalorder %s799_s8, %s795_s29 }
 0x12c   : > { %340 = vst.msk [vmem:[%s297_s28] sm:$0xff] %vm307_vm0, %v338_v9  ;;  %p797_p11 = pnand %p796_p10, %p979_p4 }
 0x12d   : > { %p802_p2 = por %p801_p0, %p800_p13 }
 0x12e   : > { %p798_p12 = pneg %p797_p11 }
 0x130   : > { %p803_p5 = pnand %p802_p2, %p798_p12 }
 0x132   : > { %806 = shalt.err (!%p803_p5)
}
 0x133   : > { %583 = dma.vmem_to_hbm [thread:$0]  (%p979_p4), %s396_s12, 128, %s398_s25, %s1051_s13  }
 0x134 PF: > { %s409_s17 = sand.u32 1, %s849_s18   ;;  %p596_p8 = pnand %p557_p6, %p987_p7 }
 0x135   : > { %s410_s7 = scalar_lea.sflag [#allocation4], %s409_s17 }
 0x136   : > { %p597_p1 = pneg %p596_p8 }
 0x138   : > { %840 = dma.done.wait (%p597_p1), %s410_s7, 128  }
 0x139   : > { %842 = vsyncadd (%p597_p1), %s410_s7, 4294967168  ;;  %s1116_s24 = sadd.s32 4294967294, %s869_s23  }
 0x13a   : > { %s419_s6 = sand.u32 1, %s1116_s24  }
 0x13b   : > { %s420_s10 = scalar_lea.sflag [#allocation9], %s419_s6 }
 0x13c   : > { %844 = dma.done.wait (%p597_p1), %s420_s10, 256  }
 0x13d   : > { %846 = vsyncadd (%p597_p1), %s420_s10, 4294967040  ;;  %s26_s23 = sadd.s32 1, %s869_s23   ;;  %s1117_s18 = smov %s853_s19 }
 0x13e   : > { %p23_p4 = scmp.ge.s32.totalorder %s26_s23, 4   ;;  %s1118_s19 = smov %s857_s20 }
 0x13f   : > { %s1119_s20 = smov %s985_s15  ;;  %s1120_s21 = smov %s865_s22 }
 0x140   : > { %s1121_s22 = smov %s1123_s9  ;;  %25 = sbr.rel (!%p23_p4) target bundleno = 11 (0xb), region = 113 }
 0x145   :  { %436 = vsyncpa [#allocation3], 1 }
 0x146   :  { %438 = vsyncpa [#allocation3 + $0x1], 1 }
 0x147   :  { %439 = vsyncpa [#allocation6], 1 }
 0x148   :  { %440 = vsyncpa [#allocation4], 1 }
 0x149   :  { %442 = vsyncpa [#allocation4 + $0x1], 1 }
 0x14a   :  { %443 = vsyncpa [#allocation9], 1 }
 0x14b   :  { %445 = vsyncpa [#allocation9 + $0x1], 1 }

</bundles_post_ra>
